<compile_context>
chip_gen: v7x
topology: tpu7x:2x2x1
jax: 0.10.0
libtpu: 0.0.40
codegen_flags: <defaults>
</compile_context>

<pallas_src>
import functools
import math

import jax
import jax.numpy as jnp
from jax.experimental import pallas as pl
from jax.experimental.pallas import tpu as pltpu


# ---------------------------------------------------------------------------
# Small helpers
# ---------------------------------------------------------------------------

def _round_up(x, m):
    return pl.cdiv(x, m) * m


def _pad2d(x, rows, cols, dtype):
    x = x.astype(dtype)
    return jnp.pad(x, ((0, rows - x.shape[0]), (0, cols - x.shape[1])))


def _vmem_budget(need_bytes):
    """Scoped-VMEM request: generous, but never the whole physical VMEM."""
    try:
        cap = pltpu.get_tpu_info().vmem_capacity_bytes
    except Exception:
        cap = 64 * 1024 * 1024  # conservative (v7x per-TC size)
    ceiling = (cap * 3) // 4          # ~48 MiB on v7x, ~96 MiB on v5e/v6e
    return int(min(max(2 * need_bytes, 16 * 1024 * 1024), ceiling))


def _default_tile_m():
    # v6e/v7x MXUs are 256 wide; 256-row tiles also halve per-step pipeline
    # overhead.  v5-class chips have 128-wide MXUs -> keep 128 there.
    try:
        kind = jax.devices()[0].device_kind.lower()
    except Exception:
        kind = ""
    return 128 if "v5" in kind else 256


# ---------------------------------------------------------------------------
# Fused small-graph path: both layers in ONE pallas_call (h stays on chip).
# ---------------------------------------------------------------------------

def _fused_gcn_kernel(adj_ref, x_ref, w1_ref, b1_ref, w2_ref, b2_ref, out_ref):
    adj = adj_ref[...]                                           # bf16 (N, N)
    # Layer 1: project then propagate, bf16 operands / f32 accumulation.
    s1 = jnp.dot(x_ref[...], w1_ref[...], preferred_element_type=jnp.float32)
    h = jnp.dot(adj, s1.astype(jnp.bfloat16), preferred_element_type=jnp.float32)
    h = jnp.maximum(h + b1_ref[...], 0.0)
    # Layer 2.
    s2 = jnp.dot(h.astype(jnp.bfloat16), w2_ref[...],
                 preferred_element_type=jnp.float32)
    out = jnp.dot(adj, s2.astype(jnp.bfloat16), preferred_element_type=jnp.float32)
    out_ref[...] = (out + b2_ref[...]).astype(out_ref.dtype)


def _gcn_forward_fused(adjacency, feature, w1, b1, w2, b2):
    n, f = adjacency.shape[0], feature.shape[1]
    hdim, c = w1.shape[1], w2.shape[1]

    n_pad = _round_up(n, 128)
    f_pad = _round_up(f, 128)
    h_pad = _round_up(hdim, 128)
    c_pad = _round_up(c, 128)

    adj_p = _pad2d(adjacency, n_pad, n_pad, jnp.bfloat16)
    x_p = _pad2d(feature, n_pad, f_pad, jnp.bfloat16)
    w1_p = _pad2d(w1, f_pad, h_pad, jnp.bfloat16)
    b1_p = _pad2d(b1.reshape(1, -1), 1, h_pad, jnp.float32)
    w2_p = _pad2d(w2, h_pad, c_pad, jnp.bfloat16)
    b2_p = _pad2d(b2.reshape(1, -1), 1, c_pad, jnp.float32)

    flops = 2 * (n_pad * f_pad * h_pad + n_pad * n_pad * h_pad
                 + n_pad * h_pad * c_pad + n_pad * n_pad * c_pad)
    bytes_accessed = (2 * (adj_p.size + x_p.size + w1_p.size + w2_p.size)
                      + 4 * (b1_p.size + b2_p.size + n_pad * c_pad))
    need = (2 * (adj_p.size + x_p.size + w1_p.size + w2_p.size)
            + 4 * (b1_p.size + b2_p.size)
            + 4 * n_pad * (h_pad + max(h_pad, c_pad))   # h / support temps
            + 2 * 4 * n_pad * c_pad)                    # output (double buf)

    logits = pl.pallas_call(
        _fused_gcn_kernel,
        out_shape=jax.ShapeDtypeStruct((n_pad, c_pad), jnp.float32),
        grid_spec=pltpu.PrefetchScalarGridSpec(
            num_scalar_prefetch=0,
            grid=(1,),
            in_specs=[
                pl.BlockSpec((n_pad, n_pad), lambda i: (0, 0)),
                pl.BlockSpec((n_pad, f_pad), lambda i: (0, 0)),
                pl.BlockSpec((f_pad, h_pad), lambda i: (0, 0)),
                pl.BlockSpec((1, h_pad), lambda i: (0, 0)),
                pl.BlockSpec((h_pad, c_pad), lambda i: (0, 0)),
                pl.BlockSpec((1, c_pad), lambda i: (0, 0)),
            ],
            out_specs=pl.BlockSpec((n_pad, c_pad), lambda i: (0, 0)),
        ),
        compiler_params=pltpu.CompilerParams(
            dimension_semantics=("arbitrary",),
            vmem_limit_bytes=_vmem_budget(need),
        ),
        cost_estimate=pl.CostEstimate(
            flops=flops, transcendentals=0, bytes_accessed=bytes_accessed),
    )(adj_p, x_p, w1_p, b1_p, w2_p, b2_p)
    return logits[:n, :c]


# ---------------------------------------------------------------------------
# Scalable path: projection pallas_call (once) + K-tiled propagation.
# ---------------------------------------------------------------------------

def _project_kernel(x_ref, w_ref, out_ref):
    # support = X @ W, computed ONCE per layer (hoisted out of propagation).
    out_ref[...] = jnp.dot(x_ref[...], w_ref[...],
                           preferred_element_type=jnp.float32).astype(out_ref.dtype)


def _project(x_p, w_p, *, tile_m):
    n_pad, f_pad = x_p.shape
    c_pad = w_p.shape[1]
    num_m = n_pad // tile_m
    # Weight block index is constant across the grid, so it is only DMA'd once;
    # its double-buffer copy is negligible here (f_pad x c_pad bf16).
    need = 2 * (2 * tile_m * f_pad + 2 * f_pad * c_pad + 2 * tile_m * c_pad)
    return pl.pallas_call(
        _project_kernel,
        out_shape=jax.ShapeDtypeStruct((n_pad, c_pad), jnp.bfloat16),
        grid_spec=pltpu.PrefetchScalarGridSpec(
            num_scalar_prefetch=0,
            grid=(num_m,),
            in_specs=[
                pl.BlockSpec((tile_m, f_pad), lambda i: (i, 0)),
                pl.BlockSpec((f_pad, c_pad), lambda i: (0, 0)),
            ],
            out_specs=pl.BlockSpec((tile_m, c_pad), lambda i: (i, 0)),
        ),
        compiler_params=pltpu.CompilerParams(
            dimension_semantics=("parallel",),
            vmem_limit_bytes=_vmem_budget(need),
        ),
    )(x_p, w_p)


def _propagate_kernel(adj_ref, sup_ref, b_ref, out_ref, acc_ref, *, apply_relu):
    k = pl.program_id(1)

    @pl.when(k == 0)
    def _():
        acc_ref[...] = jnp.zeros_like(acc_ref)

    # out[tile_m rows] += A[row tile, k tile] @ support[k tile]  (bf16 -> f32)
    acc_ref[...] += jnp.dot(adj_ref[...], sup_ref[...],
                            preferred_element_type=jnp.float32)

    @pl.when(k == pl.num_programs(1) - 1)
    def _():
        out = acc_ref[...] + b_ref[...]
        if apply_relu:
            out = jnp.maximum(out, 0.0)
        out_ref[...] = out.astype(out_ref.dtype)


def _propagate(adj_p, support, bias_p, *, tile_m, tile_k, apply_relu, out_dtype):
    n_pad = adj_p.shape[0]
    c_pad = support.shape[1]
    num_m = n_pad // tile_m
    num_k = n_pad // tile_k
    out_bytes = jnp.dtype(out_dtype).itemsize
    need = (2 * tile_m * tile_k * 2      # adjacency tile, double-buffered, bf16
            + 2 * tile_k * c_pad * 2     # support tile, double-buffered, bf16
            + 2 * c_pad * 4              # bias
            + 2 * tile_m * c_pad * out_bytes
            + tile_m * c_pad * 4)        # f32 accumulator scratch
    flops = 2 * n_pad * n_pad * c_pad
    bytes_accessed = (2 * adj_p.size + 2 * num_m * support.size
                      + 4 * bias_p.size + out_bytes * n_pad * c_pad)
    kernel = functools.partial(_propagate_kernel, apply_relu=apply_relu)
    return pl.pallas_call(
        kernel,
        out_shape=jax.ShapeDtypeStruct((n_pad, c_pad), out_dtype),
        grid_spec=pltpu.PrefetchScalarGridSpec(
            num_scalar_prefetch=0,
            grid=(num_m, num_k),                    # reduction (K) axis last
            in_specs=[
                pl.BlockSpec((tile_m, tile_k), lambda i, k: (i, k)),
                pl.BlockSpec((tile_k, c_pad), lambda i, k: (k, 0)),
                pl.BlockSpec((1, c_pad), lambda i, k: (0, 0)),
            ],
            out_specs=pl.BlockSpec((tile_m, c_pad), lambda i, k: (i, 0)),
            scratch_shapes=[pltpu.VMEM((tile_m, c_pad), jnp.float32)],
        ),
        compiler_params=pltpu.CompilerParams(
            dimension_semantics=("parallel", "arbitrary"),
            vmem_limit_bytes=_vmem_budget(need),
        ),
        cost_estimate=pl.CostEstimate(
            flops=flops, transcendentals=0, bytes_accessed=bytes_accessed),
    )(adj_p, support, bias_p)


def _gcn_forward_tiled(adjacency, feature, w1, b1, w2, b2, *, tile_m, tile_k):
    n, f = adjacency.shape[0], feature.shape[1]
    hdim, c = w1.shape[1], w2.shape[1]

    # Clamp tiles for small graphs, pad N so both tile sizes divide it.
    tile_m = min(tile_m, _round_up(n, 128))
    tile_k = min(tile_k, _round_up(n, 128))
    n_pad = _round_up(n, math.lcm(tile_m, tile_k))
    f_pad = _round_up(f, 128)
    h_pad = _round_up(hdim, 128)
    c_pad = _round_up(c, 128)

    adj_p = _pad2d(adjacency, n_pad, n_pad, jnp.bfloat16)
    x_p = _pad2d(feature, n_pad, f_pad, jnp.bfloat16)
    w1_p = _pad2d(w1, f_pad, h_pad, jnp.bfloat16)
    b1_p = _pad2d(b1.reshape(1, -1), 1, h_pad, jnp.float32)
    w2_p = _pad2d(w2, h_pad, c_pad, jnp.bfloat16)
    b2_p = _pad2d(b2.reshape(1, -1), 1, c_pad, jnp.float32)

    # Layer 1: project once, then stream A row/K tiles; h kept in bf16 so its
    # HBM writeback/readback between the layers is halved.
    s1 = _project(x_p, w1_p, tile_m=tile_m)
    h = _propagate(adj_p, s1, b1_p, tile_m=tile_m, tile_k=tile_k,
                   apply_relu=True, out_dtype=jnp.bfloat16)
    # Layer 2.
    s2 = _project(h, w2_p, tile_m=tile_m)
    logits = _propagate(adj_p, s2, b2_p, tile_m=tile_m, tile_k=tile_k,
                        apply_relu=False, out_dtype=jnp.float32)
    return logits[:n, :c]


# ---------------------------------------------------------------------------
# Public forward
# ---------------------------------------------------------------------------

def gcn_forward(adjacency, feature, w1, b1, w2, b2, *, tile_m=None,
                tile_k=1024, force_tiled=False):
    """Two-layer GCN forward, matching GcnNet.forward."""
    if tile_m is None:
        tile_m = _default_tile_m()

    n, f = adjacency.shape[0], feature.shape[1]
    h_pad = _round_up(w1.shape[1], 128)
    c_pad = _round_up(w2.shape[1], 128)
    n_pad = _round_up(n, 128)
    f_pad = _round_up(f, 128)
    # Rough working set of the fused single-call path (bf16 operands,
    # f32 temporaries).  Fuse when it fits comfortably even on v7x.
    fused_need = (2 * (n_pad * n_pad + n_pad * f_pad + f_pad * h_pad
                       + h_pad * c_pad)
                  + 4 * n_pad * (h_pad + c_pad + max(h_pad, c_pad)))
    if (not force_tiled) and fused_need <= 12 * 1024 * 1024:
        return _gcn_forward_fused(adjacency, feature, w1, b1, w2, b2)
    return _gcn_forward_tiled(adjacency, feature, w1, b1, w2, b2,
                              tile_m=tile_m, tile_k=tile_k)


def kaiming_uniform(key, shape):
    # PyTorch init.kaiming_uniform_ with a=0: bound = sqrt(6 / fan_in); torch
    # treats shape[1] as fan_in for these (in, out)-shaped GCN weights.
    fan_in = shape[1]
    bound = jnp.sqrt(6.0 / fan_in)
    return jax.random.uniform(key, shape, jnp.float32, -bound, bound)


if __name__ == "__main__":
    key = jax.random.PRNGKey(0)
    k_adj, k_feat, k_w1, k_w2 = jax.random.split(key, 4)

    # Small synthetic graph, consistent with GcnNet(input_dim) -> 16 -> 7.
    num_nodes = 256
    input_dim = 128
    hidden_dim = 16
    num_classes = 7

    # Random symmetric adjacency with self loops, normalized D^-1/2 A D^-1/2.
    a = (jax.random.uniform(k_adj, (num_nodes, num_nodes)) > 0.8).astype(jnp.float32)
    a = jnp.maximum(a, a.T) + jnp.eye(num_nodes, dtype=jnp.float32)
    deg = jnp.sum(a, axis=1)
    d_inv_sqrt = 1.0 / jnp.sqrt(deg)
    adjacency = a * d_inv_sqrt[:, None] * d_inv_sqrt[None, :]

    feature = jax.random.normal(k_feat, (num_nodes, input_dim), jnp.float32)

    # Deterministic parameter init (mirrors reset_parameters): kaiming-uniform
    # weights, zero biases.
    w1 = kaiming_uniform(k_w1, (input_dim, hidden_dim))
    b1 = jnp.zeros((hidden_dim,), jnp.float32)
    w2 = kaiming_uniform(k_w2, (hidden_dim, num_classes))
    b2 = jnp.zeros((num_classes,), jnp.float32)

    # Default path at this size: fused single pallas_call (h stays in VMEM).
    logits = gcn_forward(adjacency, feature, w1, b1, w2, b2)
    jax.block_until_ready(logits)
    assert logits.shape == (num_nodes, num_classes)

    # Also exercise the scalable project + K-tiled-propagate path.
    logits_tiled = gcn_forward(adjacency, feature, w1, b1, w2, b2,
                               force_tiled=True)
    jax.block_until_ready(logits_tiled)
    assert logits_tiled.shape == (num_nodes, num_classes)

    # bf16-matched reference (same MXU arithmetic as the kernels).
    def mm_bf16(x, y):
        return jnp.dot(x.astype(jnp.bfloat16), y.astype(jnp.bfloat16),
                       preferred_element_type=jnp.float32)

    h_m = jnp.maximum(mm_bf16(adjacency, mm_bf16(feature, w1)) + b1, 0.0)
    logits_m = mm_bf16(adjacency, mm_bf16(h_m, w2)) + b2
    assert jnp.allclose(logits, logits_m, atol=2e-2, rtol=2e-2)
    assert jnp.allclose(logits_tiled, logits_m, atol=2e-2, rtol=2e-2)

    # Full-f32 reference (loose tolerance: the kernels feed the MXU bf16).
    h_ref = jnp.maximum(adjacency @ (feature @ w1) + b1, 0.0)
    logits_ref = adjacency @ (h_ref @ w2) + b2
    assert jnp.allclose(logits, logits_ref, atol=5e-2, rtol=5e-2)
    assert jnp.allclose(logits_tiled, logits_ref, atol=5e-2, rtol=5e-2)

    print("KERNEL_OK")
</pallas_src>

<mosaic_0001>
module attributes {stable_mosaic.version = 11 : i64} {
  func.func @_fused_gcn_kernel(%arg0: i32, %arg1: memref<256x256xbf16, #tpu.memory_space<vmem>>, %arg2: memref<256x128xbf16, #tpu.memory_space<vmem>>, %arg3: memref<128x128xbf16, #tpu.memory_space<vmem>>, %arg4: memref<1x128xf32, #tpu.memory_space<vmem>>, %arg5: memref<128x128xbf16, #tpu.memory_space<vmem>>, %arg6: memref<1x128xf32, #tpu.memory_space<vmem>>, %arg7: memref<256x128xf32, #tpu.memory_space<vmem>>) attributes {dimension_semantics = [#tpu.dimension_semantics<arbitrary>], iteration_bounds = array<i64: 1>, scalar_prefetch = 0 : i64, scratch_operands = 0 : i64, tpu.core_type = #tpu.core_type<tc>, window_params = [{pipeline_mode = #tpu.pipeline_mode<synchronous>, transform_indices = @transform_0, window_bounds = array<i64: 256, 256>}, {pipeline_mode = #tpu.pipeline_mode<synchronous>, transform_indices = @transform_1, window_bounds = array<i64: 256, 128>}, {pipeline_mode = #tpu.pipeline_mode<synchronous>, transform_indices = @transform_2, window_bounds = array<i64: 128, 128>}, {pipeline_mode = #tpu.pipeline_mode<synchronous>, transform_indices = @transform_3, window_bounds = array<i64: 1, 128>}, {pipeline_mode = #tpu.pipeline_mode<synchronous>, transform_indices = @transform_4, window_bounds = array<i64: 128, 128>}, {pipeline_mode = #tpu.pipeline_mode<synchronous>, transform_indices = @transform_5, window_bounds = array<i64: 1, 128>}, {pipeline_mode = #tpu.pipeline_mode<synchronous>, transform_indices = @transform_6, window_bounds = array<i64: 256, 128>}]} {
    %c0 = arith.constant 0 : index
    %c0_0 = arith.constant 0 : index
    %0 = vector.load %arg1[%c0, %c0_0] : memref<256x256xbf16, #tpu.memory_space<vmem>>, vector<256x256xbf16>
    %c0_1 = arith.constant 0 : index
    %c0_2 = arith.constant 0 : index
    %1 = vector.load %arg2[%c0_1, %c0_2] : memref<256x128xbf16, #tpu.memory_space<vmem>>, vector<256x128xbf16>
    %c0_3 = arith.constant 0 : index
    %c0_4 = arith.constant 0 : index
    %2 = vector.load %arg3[%c0_3, %c0_4] : memref<128x128xbf16, #tpu.memory_space<vmem>>, vector<128x128xbf16>
    %cst = arith.constant dense<0.000000e+00> : vector<256x128xf32>
    %3 = tpu.matmul %1, %2, %cst {dimension_numbers = #tpu.dot_dimension_numbers<[1], [0], [0], [1], [0, 0, 1, 1], [], []>} : vector<256x128xbf16>, vector<128x128xbf16>, vector<256x128xf32> -> vector<256x128xf32>
    %4 = arith.truncf %3 : vector<256x128xf32> to vector<256x128xbf16>
    %cst_5 = arith.constant dense<0.000000e+00> : vector<256x128xf32>
    %5 = tpu.matmul %0, %4, %cst_5 {dimension_numbers = #tpu.dot_dimension_numbers<[1], [0], [0], [1], [0, 0, 1, 1], [], []>} : vector<256x256xbf16>, vector<256x128xbf16>, vector<256x128xf32> -> vector<256x128xf32>
    %c0_6 = arith.constant 0 : index
    %c0_7 = arith.constant 0 : index
    %6 = vector.load %arg4[%c0_6, %c0_7] : memref<1x128xf32, #tpu.memory_space<vmem>>, vector<1x128xf32>
    %7 = vector.broadcast %6 : vector<1x128xf32> to vector<256x128xf32>
    %8 = arith.addf %5, %7 : vector<256x128xf32>
    %cst_8 = arith.constant 0.000000e+00 : f32
    %9 = vector.broadcast %cst_8 : f32 to vector<256x128xf32>
    %10 = arith.maximumf %8, %9 : vector<256x128xf32>
    %11 = arith.truncf %10 : vector<256x128xf32> to vector<256x128xbf16>
    %c0_9 = arith.constant 0 : index
    %c0_10 = arith.constant 0 : index
    %12 = vector.load %arg5[%c0_9, %c0_10] : memref<128x128xbf16, #tpu.memory_space<vmem>>, vector<128x128xbf16>
    %cst_11 = arith.constant dense<0.000000e+00> : vector<256x128xf32>
    %13 = tpu.matmul %11, %12, %cst_11 {dimension_numbers = #tpu.dot_dimension_numbers<[1], [0], [0], [1], [0, 0, 1, 1], [], []>} : vector<256x128xbf16>, vector<128x128xbf16>, vector<256x128xf32> -> vector<256x128xf32>
    %14 = arith.truncf %13 : vector<256x128xf32> to vector<256x128xbf16>
    %cst_12 = arith.constant dense<0.000000e+00> : vector<256x128xf32>
    %15 = tpu.matmul %0, %14, %cst_12 {dimension_numbers = #tpu.dot_dimension_numbers<[1], [0], [0], [1], [0, 0, 1, 1], [], []>} : vector<256x256xbf16>, vector<256x128xbf16>, vector<256x128xf32> -> vector<256x128xf32>
    %c0_13 = arith.constant 0 : index
    %c0_14 = arith.constant 0 : index
    %16 = vector.load %arg6[%c0_13, %c0_14] : memref<1x128xf32, #tpu.memory_space<vmem>>, vector<1x128xf32>
    %17 = vector.broadcast %16 : vector<1x128xf32> to vector<256x128xf32>
    %18 = arith.addf %15, %17 : vector<256x128xf32>
    %c0_15 = arith.constant 0 : index
    %c0_16 = arith.constant 0 : index
    %19 = vector.load %arg7[%c0_15, %c0_16] : memref<256x128xf32, #tpu.memory_space<vmem>>, vector<256x128xf32>
    tpu.vector_store %arg7[%c0_15, %c0_16], %18 {strides = array<i32>} : memref<256x128xf32, #tpu.memory_space<vmem>>, vector<256x128xf32>,
    return
  }
  func.func @transform_0(%arg0: i32) -> (i32, i32) {
    %c0_i32 = arith.constant 0 : i32
    %c0_i32_0 = arith.constant 0 : i32
    %c0_i32_1 = arith.constant 0 : i32
    return %c0_i32, %c0_i32_0 : i32, i32
  }
  func.func @transform_1(%arg0: i32) -> (i32, i32) {
    %c0_i32 = arith.constant 0 : i32
    %c0_i32_0 = arith.constant 0 : i32
    %c0_i32_1 = arith.constant 0 : i32
    return %c0_i32, %c0_i32_0 : i32, i32
  }
  func.func @transform_2(%arg0: i32) -> (i32, i32) {
    %c0_i32 = arith.constant 0 : i32
    %c0_i32_0 = arith.constant 0 : i32
    %c0_i32_1 = arith.constant 0 : i32
    return %c0_i32, %c0_i32_0 : i32, i32
  }
  func.func @transform_3(%arg0: i32) -> (i32, i32) {
    %c0_i32 = arith.constant 0 : i32
    %c0_i32_0 = arith.constant 0 : i32
    %c0_i32_1 = arith.constant 0 : i32
    return %c0_i32, %c0_i32_0 : i32, i32
  }
  func.func @transform_4(%arg0: i32) -> (i32, i32) {
    %c0_i32 = arith.constant 0 : i32
    %c0_i32_0 = arith.constant 0 : i32
    %c0_i32_1 = arith.constant 0 : i32
    return %c0_i32, %c0_i32_0 : i32, i32
  }
  func.func @transform_5(%arg0: i32) -> (i32, i32) {
    %c0_i32 = arith.constant 0 : i32
    %c0_i32_0 = arith.constant 0 : i32
    %c0_i32_1 = arith.constant 0 : i32
    return %c0_i32, %c0_i32_0 : i32, i32
  }
  func.func @transform_6(%arg0: i32) -> (i32, i32) {
    %c0_i32 = arith.constant 0 : i32
    %c0_i32_0 = arith.constant 0 : i32
    %c0_i32_1 = arith.constant 0 : i32
    return %c0_i32, %c0_i32_0 : i32, i32
  }
}

</mosaic_0001>

<bundles_post_ra>
// kernel: tpu_custom_call.1
= control target key start
LH: loop header
LB: loop body
LE: loop exit
PB: predicated region body
PF: predicated region fallthrough
CT: control target
= control target key end

     0   :  { %11 = vsyncpa [#allocation3], 0  ;;  %s2286_s0 = inlined_call_operand.hbm [shape: bf16[256,256], index: 0, kind: input, shape index: {}]   ;;  %s2287_s1 = inlined_call_operand.hbm [shape: bf16[256,128], index: 1, kind: input, shape index: {}]   ;;  %s2288_s2 = inlined_call_operand.hbm [shape: bf16[128,128], index: 2, kind: input, shape index: {}]   ;;  %s2289_s3 = inlined_call_operand.vmem [shape: f32[1,128], index: 3, kind: input, shape index: {}]   ;;  %s2290_s4 = inlined_call_operand.hbm [shape: bf16[128,128], index: 4, kind: input, shape index: {}]   ;;  %s2291_s5 = inlined_call_operand.vmem [shape: f32[1,128], index: 5, kind: input, shape index: {}]   ;;  %s2292_s6 = inlined_call_operand.hbm [shape: f32[256,128], index: 6, kind: output, shape index: {}]  }
   0x1   :  { %12 = vsyncpa [#allocation6], 0 }
   0x2   :  { %13 = vsyncpa [#allocation9], 0 }
   0x3   :  { %14 = vsyncpa [#allocation4], 0  ;;  %s1958_s21 = smov [#allocation5]   ;;  %s1840_s25 = scalar_lea.hbm %s2287_s1, 2048 }
   0x4   :  { %s32_s22 = sshll.u32 %s1958_s21, 4  ;;  %p1841_p0 = scmp.ne.s32.totalorder %s2287_s1, %s1840_s25  ;;  %s33_s22 = int_to_ptr.vmem [resolvable:$true] %s32_s22 }
   0x5   :  { %p1844_p1 = scmp.lt.u32.totalorder %s1840_s25, %s2287_s1 }
   0x7   :  { %p1846_p2 = pnand %p1844_p1, %p1841_p0 }
   0x9   :  { %1849 = shalt.err (!%p1846_p2)
}
   0xa   :  { %s1850_s30 = scalar_lea.vmem %s33_s22, 2048  ;;  %p1855_p4 = scmp.lt.s32.totalorder %s33_s22, %s33_s22 }
   0xb   :  { %p1851_p3 = scmp.ne.s32.totalorder %s33_s22, %s1850_s30  ;;  %p1856_p5 = scmp.lt.s32.totalorder %s1850_s30, %s1850_s30 }
   0xd   :  { %p1857_p6 = por %p1856_p5, %p1855_p4 }
   0xf   :  { %p1858_p7 = pnand %p1857_p6, %p1851_p3 }
  0x11   :  { %1861 = shalt.err (!%p1858_p7)
}
  0x12   :  { %s1959_s7 = smov 64   ;;  %s1960_s8 = smov 4  }
  0x13   :  { %38 = dma.hbm_to_vmem [thread:$0]  %s2287_s1, 2048, %s33_s22, [#allocation6], %s1959_s7, %s1959_s7, %s1960_s8  }
  0x14   :  { %s1961_s11 = smov [#allocation2]   ;;  %s1862_s15 = scalar_lea.hbm %s2286_s0, 4096 }
  0x15   :  { %s20_s12 = sshll.u32 %s1961_s11, 4  ;;  %p1863_p8 = scmp.ne.s32.totalorder %s2286_s0, %s1862_s15  ;;  %s21_s12 = int_to_ptr.vmem [resolvable:$true] %s20_s12 }
  0x16   :  { %p1866_p9 = scmp.lt.u32.totalorder %s1862_s15, %s2286_s0 }
  0x18   :  { %p1868_p10 = pnand %p1866_p9, %p1863_p8 }
  0x1a   :  { %1871 = shalt.err (!%p1868_p10)
}
  0x1b   :  { %s1872_s20 = scalar_lea.vmem %s21_s12, 4096  ;;  %p1877_p12 = scmp.lt.s32.totalorder %s21_s12, %s21_s12 }
  0x1c   :  { %p1873_p11 = scmp.ne.s32.totalorder %s21_s12, %s1872_s20  ;;  %p1878_p13 = scmp.lt.s32.totalorder %s1872_s20, %s1872_s20 }
  0x1e   :  { %p1879_p0 = por %p1878_p13, %p1877_p12 }
  0x20   :  { %p1880_p1 = pnand %p1879_p0, %p1873_p11 }
  0x22   :  { %1883 = shalt.err (!%p1880_p1)
}
  0x23   :  { %s1962_s1 = smov 128   ;;  %s1963_s21 = smov 8  }
  0x24   :  { %26 = dma.hbm_to_vmem [thread:$0]  %s2286_s0, 4096, %s21_s12, [#allocation3], %s1962_s1, %s1962_s1, %s1963_s21  }
  0x25   :  { %s1964_s24 = smov [#allocation7]   ;;  %s1965_s26 = smov [#allocation8]  }
  0x26   :  { %s44_s25 = sshll.u32 %s1964_s24, 4  ;;  %s58_s27 = sshll.u32 %s1965_s26, 4  ;;  %s45_s25 = int_to_ptr.vmem [resolvable:$true] %s44_s25  ;;  %s2032_s27 = int_to_ptr.vmem [resolvable:$true] %s58_s27 }
  0x27   :  { %s1884_s30 = scalar_lea.hbm %s2288_s2, 1024 }
  0x28   :  { %p1885_p2 = scmp.ne.s32.totalorder %s2288_s2, %s1884_s30  ;;  %p1888_p3 = scmp.lt.u32.totalorder %s1884_s30, %s2288_s2 }
  0x2a   :  { %p1890_p4 = pnand %p1888_p3, %p1885_p2 }
  0x2c   :  { %1893 = shalt.err (!%p1890_p4)
}
  0x2d   :  { %s1894_s0 = scalar_lea.vmem %s45_s25, 1024  ;;  %p1899_p6 = scmp.lt.s32.totalorder %s45_s25, %s45_s25 }
  0x2e   :  { %p1895_p5 = scmp.ne.s32.totalorder %s45_s25, %s1894_s0  ;;  %p1900_p7 = scmp.lt.s32.totalorder %s1894_s0, %s1894_s0 }
  0x30   :  { %p1901_p8 = por %p1900_p7, %p1899_p6 }
  0x32   :  { %p1902_p9 = pnand %p1901_p8, %p1895_p5 }
  0x34   :  { %1905 = shalt.err (!%p1902_p9)
}
  0x35   :  { %50 = dma.hbm_to_vmem [thread:$0]  %s2288_s2, 1024, %s45_s25, [#allocation6], %s1959_s7, %s1959_s7, %s1960_s8  }
  0x36   :  { %s1906_s17 = scalar_lea.hbm %s2290_s4, 1024 }
  0x37   :  { %p1907_p10 = scmp.ne.s32.totalorder %s2290_s4, %s1906_s17  ;;  %p1910_p11 = scmp.lt.u32.totalorder %s1906_s17, %s2290_s4 }
  0x39   :  { %p1912_p12 = pnand %p1910_p11, %p1907_p10 }
  0x3b   :  { %1915 = shalt.err (!%p1912_p12)
}
  0x3c   :  { %s1916_s23 = scalar_lea.vmem %s2032_s27, 1024  ;;  %p1921_p0 = scmp.lt.s32.totalorder %s2032_s27, %s2032_s27 }
  0x3d   :  { %p1917_p13 = scmp.ne.s32.totalorder %s2032_s27, %s1916_s23  ;;  %p1922_p1 = scmp.lt.s32.totalorder %s1916_s23, %s1916_s23 }
  0x3f   :  { %p1923_p2 = por %p1922_p1, %p1921_p0 }
  0x41   :  { %p1924_p3 = pnand %p1923_p2, %p1917_p13 }
  0x43   :  { %1927 = shalt.err (!%p1924_p3)
}
  0x44   :  { %64 = dma.hbm_to_vmem [thread:$0]  %s2290_s4, 1024, %s2032_s27, [#allocation9], %s1959_s7, %s1959_s7, %s1960_s8  }
  0x45   :  { %1950 = dma.done.wait [#allocation3], 4096  }
  0x46   :  { %1951 = vsyncadd [#allocation3], 4294963200 }
  0x47   :  { %1952 = dma.done.wait [#allocation6], 3072  }
  0x48   :  { %1953 = vsyncadd [#allocation6], 4294964224 }
  0x49   :  { %1954 = dma.done.wait [#allocation9], 1024  }
  0x4a   :  { %1955 = vsyncadd [#allocation9], 4294966272  ;;  %v1760_v0 = vld [vmem:[#allocation7] sm:$0xff]   ;;  %v1761_v1 = vld [vmem:[#allocation7 + $0x8] sm:$0xff]  }
  0x4b   :  { %1655 = vmatprep.subr.bf16.mxu1 %v1760_v0  ;;  %v1762_v2 = vld [vmem:[#allocation7 + $0x10] sm:$0xff]   ;;  %v1763_v3 = vld [vmem:[#allocation7 + $0x18] sm:$0xff]   ;;  %v1768_v4 = vld [vmem:[#allocation5] sm:$0xff]  }
  0x4c   :  { %1656 = vmatpush3.bf16.msra.mxu1 %v1760_v0  ;;  %1671 = vmatprep.mubr.bf16.mxu1 %v1768_v4  ;;  %v1764_v5 = vld [vmem:[#allocation7 + $0x20] sm:$0xff]   ;;  %v1765_v6 = vld [vmem:[#allocation7 + $0x28] sm:$0xff]   ;;  %v1766_v7 = vld [vmem:[#allocation7 + $0x30] sm:$0xff]  }
  0x4d   :  { %1657 = vmatprep.subr.bf16.mxu1 %v1761_v1  ;;  %v1767_v8 = vld [vmem:[#allocation7 + $0x38] sm:$0xff]   ;;  %v1769_v9 = vld [vmem:[#allocation5 + $0x8] sm:$0xff]   ;;  %v1770_v10 = vld [vmem:[#allocation5 + $0x10] sm:$0xff]  }
  0x4e   :  { %v1771_v11 = vld [vmem:[#allocation5 + $0x18] sm:$0xff]   ;;  %v1772_v12 = vld [vmem:[#allocation5 + $0x20] sm:$0xff]   ;;  %v1773_v13 = vld [vmem:[#allocation5 + $0x28] sm:$0xff]  }
  0x4f   :  { %v1774_v14 = vld [vmem:[#allocation5 + $0x30] sm:$0xff]   ;;  %v1775_v15 = vld [vmem:[#allocation5 + $0x38] sm:$0xff]   ;;  %v1776_v16 = vld [vmem:[#allocation5 + $0x40] sm:$0xff]  }
  0x50   :  { %1658 = vmatpush3.bf16.msra.mxu1 %v1761_v1  ;;  %v1777_v17 = vld [vmem:[#allocation5 + $0x48] sm:$0xff]   ;;  %v1778_v18 = vld [vmem:[#allocation5 + $0x50] sm:$0xff]   ;;  %v1779_v19 = vld [vmem:[#allocation5 + $0x58] sm:$0xff]  }
  0x51   :  { %1659 = vmatprep.subr.bf16.mxu1 %v1762_v2  ;;  %v1780_v20 = vld [vmem:[#allocation5 + $0x60] sm:$0xff]   ;;  %v1781_v21 = vld [vmem:[#allocation5 + $0x68] sm:$0xff]   ;;  %v1782_v22 = vld [vmem:[#allocation5 + $0x70] sm:$0xff]  }
  0x52   :  { %v1783_v23 = vld [vmem:[#allocation5 + $0x78] sm:$0xff]   ;;  %v2069_v24 = vld [vmem:[#allocation2 + $0x4] ss:$8 sps:$4 sm:$0xff]  }
  0x54   :  { %1660 = vmatpush3.bf16.msra.mxu1 %v1762_v2 }
  0x55   :  { %1661 = vmatprep.subr.bf16.mxu1 %v1763_v3 }
  0x58   :  { %1662 = vmatpush3.bf16.msra.mxu1 %v1763_v3 }
  0x59   :  { %1663 = vmatprep.subr.bf16.mxu1 %v1764_v5 }
  0x5c   :  { %1664 = vmatpush3.bf16.msra.mxu1 %v1764_v5 }
  0x5d   :  { %1665 = vmatprep.subr.bf16.mxu1 %v1765_v6 }
  0x60   :  { %1666 = vmatpush3.bf16.msra.mxu1 %v1765_v6 }
  0x61   :  { %1667 = vmatprep.subr.bf16.mxu1 %v1766_v7 }
  0x64   :  { %1668 = vmatpush3.bf16.msra.mxu1 %v1766_v7 }
  0x65   :  { %1669 = vmatprep.subr.bf16.mxu1 %v1767_v8 }
  0x68   :  { %1670 = vmatpush3.bf16.msra.mxu1 %v1767_v8 }
  0x6b   :  { %1672 = vmatmul.mubr.bf16.vlgmr.msra.gmra.mrb[0].mxu1 %v1769_v9  ;;  %v1832_v9 = vld [vmem:[#allocation8] sm:$0xff]  }
  0x6c   :  { %1675 = vmatprep.mubr.bf16.mxu1 %v1770_v10  ;;  %v1833_v10 = vld [vmem:[#allocation8 + $0x8] sm:$0xff]   ;;  %1703 = vmatprep.subr.bf16.mxu0 %v1832_v9 }
  0x6d   :  { %1704 = vmatpush3.bf16.msra.mxu0 %v1832_v9 }
  0x6e   :  { %1705 = vmatprep.subr.bf16.mxu0 %v1833_v10 }
  0x71   :  { %1706 = vmatpush3.bf16.msra.mxu0 %v1833_v10 }
  0x73   :  { %1676 = vmatmul.mubr.bf16.gmra.mrb[4].mxu1 %v1771_v11  ;;  %v2072_v11 = vld [vmem:[#allocation2] ss:$8 sps:$4 sm:$0xff]  }
  0x74   :  { %1679 = vmatprep.mubr.bf16.mxu1 %v1772_v12  ;;  %v1834_v12 = vld [vmem:[#allocation8 + $0x10] sm:$0xff]  }
  0x75   :  { %1707 = vmatprep.subr.bf16.mxu0 %v1834_v12 }
  0x76   :  { %1708 = vmatpush3.bf16.msra.mxu0 %v1834_v12 }
  0x7b   :  { %1680 = vmatmul.mubr.bf16.gmra.mrb[8].mxu1 %v1773_v13  ;;  %v2074_v13 = vld [vmem:[#allocation2 + $0x14] ss:$8 sps:$4 sm:$0xff]  }
  0x7c   :  { %1683 = vmatprep.mubr.bf16.mxu1 %v1774_v14  ;;  %v1835_v14 = vld [vmem:[#allocation8 + $0x18] sm:$0xff]  }
  0x7d   :  { %1709 = vmatprep.subr.bf16.mxu0 %v1835_v14 }
  0x7e   :  { %1710 = vmatpush3.bf16.msra.mxu0 %v1835_v14 }
  0x83   :  { %1684 = vmatmul.mubr.bf16.gmra.mrb[12].mxu1 %v1775_v15  ;;  %v2078_v15 = vld [vmem:[#allocation2 + $0x10] ss:$8 sps:$4 sm:$0xff]  }
  0x84   :  { %1687 = vmatprep.mubr.bf16.mxu1 %v1776_v16  ;;  %v2080_v16 = vld [vmem:[#allocation2 + $0x24] ss:$8 sps:$4 sm:$0xff]  }
  0x8b   :  { %1688 = vmatmul.mubr.bf16.gmra.mrb[16].mxu1 %v1777_v17  ;;  %v2084_v17 = vld [vmem:[#allocation2 + $0x20] ss:$8 sps:$4 sm:$0xff]  }
  0x8c   :  { %1691 = vmatprep.mubr.bf16.mxu1 %v1778_v18  ;;  %v2086_v18 = vld [vmem:[#allocation2 + $0x34] ss:$8 sps:$4 sm:$0xff]  }
  0x93   :  { %1692 = vmatmul.mubr.bf16.gmra.mrb[20].mxu1 %v1779_v19  ;;  %v2090_v19 = vld [vmem:[#allocation2 + $0x30] ss:$8 sps:$4 sm:$0xff]  }
  0x94   :  { %1695 = vmatprep.mubr.bf16.mxu1 %v1780_v20  ;;  %v2092_v20 = vld [vmem:[#allocation2 + $0x44] ss:$8 sps:$4 sm:$0xff]  }
  0x9b   :  { %1696 = vmatmul.mubr.bf16.gmra.mrb[24].mxu1 %v1781_v21  ;;  %v2096_v21 = vld [vmem:[#allocation2 + $0x40] ss:$8 sps:$4 sm:$0xff]  }
  0x9c   :  { %1699 = vmatprep.mubr.bf16.mxu1 %v1782_v22  ;;  %v2098_v22 = vld [vmem:[#allocation2 + $0x54] ss:$8 sps:$4 sm:$0xff]  }
  0xa3   :  { %1700 = vmatmul.mubr.bf16.gmra.mrb[28].mxu1 %v1783_v23  ;;  %v2102_v23 = vld [vmem:[#allocation2 + $0x50] ss:$8 sps:$4 sm:$0xff]  }
  0xa4   :  { %680 = vmatprep.mubr.bf16.mxu1 %v2069_v24 }
 0x13e   :  { %v1673_v25 = vpop.f32.mrb[0].mxu1 }
 0x13f   :  { %v338_v26 = vpop.f32.mrb[1].mxu1 }
 0x140   :  { %v1674_v27 = vpop.f32.mrb[2].mxu1 }
 0x141   :  { %v466_v28 = vpack.c.bf16 %v1674_v27, %v1673_v25  ;;  %v341_v29 = vpop.f32.mrb[3].mxu1  ;;  %v2104_v25 = vld [vmem:[#allocation2 + $0x64] ss:$8 sps:$4 sm:$0xff]   ;;  %v2110_v27 = vld [vmem:[#allocation2 + $0x74] ss:$8 sps:$4 sm:$0xff]  }
 0x142   :  { %v465_v30 = vpack.c.bf16 %v341_v29, %v338_v26  ;;  %v2108_v26 = vld [vmem:[#allocation2 + $0x60] ss:$8 sps:$4 sm:$0xff]   ;;  %v2116_v29 = vld [vmem:[#allocation2 + $0x84] ss:$8 sps:$4 sm:$0xff]  }
 0x146   :  { %v1677_v31 = vpop.f32.mrb[4].mxu1 }
 0x147   :  { %v354_v32 = vpop.f32.mrb[5].mxu1 }
 0x148   :  { %v1678_v33 = vpop.f32.mrb[6].mxu1 }
 0x149   :  { %v468_v34 = vpack.c.bf16 %v1678_v33, %v1677_v31  ;;  %v357_v35 = vpop.f32.mrb[7].mxu1  ;;  %v2122_v31 = vld [vmem:[#allocation2 + $0x94] ss:$8 sps:$4 sm:$0xff]   ;;  %v2128_v33 = vld [vmem:[#allocation2 + $0xa4] ss:$8 sps:$4 sm:$0xff]  }
 0x14a   :  { %v467_v36 = vpack.c.bf16 %v357_v35, %v354_v32  ;;  %v2126_v32 = vld [vmem:[#allocation2 + $0x90] ss:$8 sps:$4 sm:$0xff]   ;;  %v2134_v35 = vld [vmem:[#allocation2 + $0xb4] ss:$8 sps:$4 sm:$0xff]  }
 0x14e   :  { %v1681_v37 = vpop.f32.mrb[8].mxu1 }
 0x14f   :  { %v370_v38 = vpop.f32.mrb[9].mxu1 }
 0x150   :  { %v1682_v39 = vpop.f32.mrb[10].mxu1 }
 0x151   :  { %v470_v40 = vpack.c.bf16 %v1682_v39, %v1681_v37  ;;  %v373_v41 = vpop.f32.mrb[11].mxu1  ;;  %v2140_v37 = vld [vmem:[#allocation2 + $0xc4] ss:$8 sps:$4 sm:$0xff]  }
 0x152   :  { %v469_v42 = vpack.c.bf16 %v373_v41, %v370_v38  ;;  %v1836_v38 = vld [vmem:[#allocation8 + $0x20] sm:$0xff]   ;;  %v1837_v39 = vld [vmem:[#allocation8 + $0x28] sm:$0xff]   ;;  %v2146_v41 = vld [vmem:[#allocation2 + $0xd4] ss:$8 sps:$4 sm:$0xff]  }
 0x153   :  { %1711 = vmatprep.subr.bf16.mxu0 %v1836_v38 }
 0x154   :  { %1712 = vmatpush3.bf16.msra.mxu0 %v1836_v38 }
 0x155   :  { %1713 = vmatprep.subr.bf16.mxu0 %v1837_v39 }
 0x156   :  { %v1685_v43 = vpop.f32.mrb[12].mxu1 }
 0x157   :  { %v386_v44 = vpop.f32.mrb[13].mxu1 }
 0x158   :  { %v1686_v45 = vpop.f32.mrb[14].mxu1  ;;  %1714 = vmatpush3.bf16.msra.mxu0 %v1837_v39 }
 0x159   :  { %v472_v46 = vpack.c.bf16 %v1686_v45, %v1685_v43  ;;  %v389_v47 = vpop.f32.mrb[15].mxu1  ;;  %v1839_v43 = vld [vmem:[#allocation8 + $0x38] sm:$0xff]   ;;  %v2152_v45 = vld [vmem:[#allocation2 + $0xe4] ss:$8 sps:$4 sm:$0xff]  }
 0x15a   :  { %v471_v48 = vpack.c.bf16 %v389_v47, %v386_v44  ;;  %v2150_v44 = vld [vmem:[#allocation2 + $0xd0] ss:$8 sps:$4 sm:$0xff]   ;;  %v2158_v47 = vld [vmem:[#allocation2 + $0xf4] ss:$8 sps:$4 sm:$0xff]  }
 0x15e   :  { %v1689_v49 = vpop.f32.mrb[16].mxu1 }
 0x15f   :  { %v402_v50 = vpop.f32.mrb[17].mxu1 }
 0x160   :  { %v1690_v51 = vpop.f32.mrb[18].mxu1 }
 0x161   :  { %v474_v52 = vpack.c.bf16 %v1690_v51, %v1689_v49  ;;  %v405_v53 = vpop.f32.mrb[19].mxu1  ;;  %v2168_v51 = vld [vmem:[%s2289_s3] ss:$0 sm:$0xff] }
 0x162   :  { %v473_v54 = vpack.c.bf16 %v405_v53, %v402_v50 }
 0x164   :  { %1407 = vmatprep.subr.bf16.mxu1 %v473_v54 }
 0x165   :  { %1408 = vmatpush3.bf16.msra.mxu1 %v465_v30  ;;  %v2120_v30 = vld [vmem:[#allocation2 + $0x80] ss:$8 sps:$4 sm:$0xff]  }
 0x166   :  { %v1693_v55 = vpop.f32.mrb[20].mxu1  ;;  %1409 = vmatprep.subr.bf16.mxu1 %v474_v52 }
 0x167   :  { %v418_v56 = vpop.f32.mrb[21].mxu1 }
 0x168   :  { %v1694_v57 = vpop.f32.mrb[22].mxu1 }
 0x169   :  { %v476_v58 = vpack.c.bf16 %v1694_v57, %v1693_v55  ;;  %v421_v59 = vpop.f32.mrb[23].mxu1  ;;  %1410 = vmatpush3.bf16.msra.mxu1 %v466_v28  ;;  %v2114_v28 = vld [vmem:[#allocation2 + $0x70] ss:$8 sps:$4 sm:$0xff]  }
 0x16a   :  { %v475_v60 = vpack.c.bf16 %v421_v59, %v418_v56 }
 0x16c   :  { %1411 = vmatprep.subr.bf16.mxu1 %v475_v60 }
 0x16d   :  { %1412 = vmatpush3.bf16.msra.mxu1 %v467_v36  ;;  %v2138_v36 = vld [vmem:[#allocation2 + $0xb0] ss:$8 sps:$4 sm:$0xff]  }
 0x16e   :  { %v1697_v61 = vpop.f32.mrb[24].mxu1  ;;  %1413 = vmatprep.subr.bf16.mxu1 %v476_v58 }
 0x16f   :  { %v434_v62 = vpop.f32.mrb[25].mxu1 }
 0x170   :  { %v1698_v63 = vpop.f32.mrb[26].mxu1 }
 0x171   :  { %v478_v0 = vpack.c.bf16 %v1698_v63, %v1697_v61  ;;  %v437_v1 = vpop.f32.mrb[27].mxu1  ;;  %1414 = vmatpush3.bf16.msra.mxu1 %v468_v34  ;;  %v2132_v34 = vld [vmem:[#allocation2 + $0xa0] ss:$8 sps:$4 sm:$0xff]  }
 0x172   :  { %v477_v2 = vpack.c.bf16 %v437_v1, %v434_v62 }
 0x174   :  { %1415 = vmatprep.subr.bf16.mxu1 %v477_v2 }
 0x175   :  { %1416 = vmatpush3.bf16.msra.mxu1 %v469_v42  ;;  %v1838_v42 = vld [vmem:[#allocation8 + $0x30] sm:$0xff]  }
 0x176   :  { %v1701_v3 = vpop.f32.mrb[28].mxu1  ;;  %1417 = vmatprep.subr.bf16.mxu1 %v478_v0  ;;  %1715 = vmatprep.subr.bf16.mxu0 %v1838_v42 }
 0x177   :  { %v450_v4 = vpop.f32.mrb[29].mxu1  ;;  %1716 = vmatpush3.bf16.msra.mxu0 %v1838_v42 }
 0x178   :  { %v1702_v5 = vpop.f32.mrb[30].mxu1  ;;  %1717 = vmatprep.subr.bf16.mxu0 %v1839_v43 }
 0x179   :  { %v480_v6 = vpack.c.bf16 %v1702_v5, %v1701_v3  ;;  %v453_v7 = vpop.f32.mrb[31].mxu1  ;;  %1418 = vmatpush3.bf16.msra.mxu1 %v470_v40  ;;  %v2144_v40 = vld [vmem:[#allocation2 + $0xc0] ss:$8 sps:$4 sm:$0xff]  }
 0x17a   :  { %v479_v8 = vpack.c.bf16 %v453_v7, %v450_v4 }
 0x17b   :  { %1718 = vmatpush3.bf16.msra.mxu0 %v1839_v43 }
 0x17c   :  { %1419 = vmatprep.subr.bf16.mxu1 %v479_v8 }
 0x17d   :  { %1420 = vmatpush3.bf16.msra.mxu1 %v471_v48  ;;  %v2162_v48 = vld [vmem:[#allocation2 + $0xf0] ss:$8 sps:$4 sm:$0xff]  }
 0x17e   :  { %1421 = vmatprep.subr.bf16.mxu1 %v480_v6 }
 0x181   :  { %1422 = vmatpush3.bf16.msra.mxu1 %v472_v46  ;;  %v2156_v46 = vld [vmem:[#allocation2 + $0xe0] ss:$8 sps:$4 sm:$0xff]  }
 0x184   :  { %681 = vmatmul.mubr.bf16.vlgmr.msra.gmra.mrb[32].mxu1 %v2072_v11 }
 0x185   :  { %688 = vmatprep.mubr.bf16.mxu1 %v2074_v13 }
 0x18c   :  { %689 = vmatmul.mubr.bf16.gmra.mrb[36].mxu1 %v2078_v15 }
 0x18d   :  { %696 = vmatprep.mubr.bf16.mxu1 %v2080_v16 }
 0x194   :  { %697 = vmatmul.mubr.bf16.gmra.mrb[40].mxu1 %v2084_v17 }
 0x195   :  { %704 = vmatprep.mubr.bf16.mxu1 %v2086_v18 }
 0x19c   :  { %705 = vmatmul.mubr.bf16.gmra.mrb[44].mxu1 %v2090_v19 }
 0x19d   :  { %712 = vmatprep.mubr.bf16.mxu1 %v2092_v20 }
 0x1a4   :  { %713 = vmatmul.mubr.bf16.gmra.mrb[48].mxu1 %v2096_v21 }
 0x1a5   :  { %720 = vmatprep.mubr.bf16.mxu1 %v2098_v22 }
 0x1ac   :  { %721 = vmatmul.mubr.bf16.gmra.mrb[52].mxu1 %v2102_v23 }
 0x1ad   :  { %728 = vmatprep.mubr.bf16.mxu1 %v2104_v25 }
 0x1b4   :  { %729 = vmatmul.mubr.bf16.gmra.mrb[56].mxu1 %v2108_v26 }
 0x1b5   :  { %736 = vmatprep.mubr.bf16.mxu1 %v2110_v27 }
 0x1bc   :  { %737 = vmatmul.mubr.bf16.gmra.mrb[60].mxu1 %v2114_v28 }
 0x1bd   :  { %744 = vmatprep.mubr.bf16.mxu1 %v2116_v29 }
 0x1c4   :  { %745 = vmatmul.mubr.bf16.gmra.mrb[64].mxu1 %v2120_v30 }
 0x1c5   :  { %752 = vmatprep.mubr.bf16.mxu1 %v2122_v31 }
 0x1cc   :  { %753 = vmatmul.mubr.bf16.gmra.mrb[68].mxu1 %v2126_v32 }
 0x1cd   :  { %760 = vmatprep.mubr.bf16.mxu1 %v2128_v33 }
 0x1d4   :  { %761 = vmatmul.mubr.bf16.gmra.mrb[72].mxu1 %v2132_v34 }
 0x1d5   :  { %768 = vmatprep.mubr.bf16.mxu1 %v2134_v35 }
 0x1dc   :  { %769 = vmatmul.mubr.bf16.gmra.mrb[76].mxu1 %v2138_v36 }
 0x1dd   :  { %776 = vmatprep.mubr.bf16.mxu1 %v2140_v37 }
 0x1e4   :  { %777 = vmatmul.mubr.bf16.gmra.mrb[80].mxu1 %v2144_v40 }
 0x1e5   :  { %784 = vmatprep.mubr.bf16.mxu1 %v2146_v41 }
 0x1ec   :  { %785 = vmatmul.mubr.bf16.gmra.mrb[84].mxu1 %v2150_v44 }
 0x1ed   :  { %792 = vmatprep.mubr.bf16.mxu1 %v2152_v45 }
 0x1f4   :  { %793 = vmatmul.mubr.bf16.gmra.mrb[88].mxu1 %v2156_v46 }
 0x1f5   :  { %800 = vmatprep.mubr.bf16.mxu1 %v2158_v47 }
 0x1fc   :  { %801 = vmatmul.mubr.bf16.gmra.mrb[92].mxu1 %v2162_v48 }
 0x257   :  { %v1423_v49 = vpop.f32.mrb[32].mxu1 }
 0x258   :  { %v1424_v50 = vpop.f32.mrb[33].mxu1 }
 0x259   :  { %v1425_v52 = vadd.f32 %v1424_v50, %v1423_v49  ;;  %v1426_v53 = vpop.f32.mrb[34].mxu1 }
 0x25a   :  { %v1427_v54 = vpop.f32.mrb[35].mxu1 }
 0x25b   :  { %v1428_v55 = vadd.f32 %v1427_v54, %v1426_v53  ;;  %v683_v56 = vadd.f32 %v1425_v52, %v2168_v51 }
 0x25d   :  { %v686_v57 = vadd.f32 %v1428_v55, %v2168_v51  ;;  %v809_v59 = vmax.f32 %v683_v56, 0.0 }
 0x25f   :  { %v1429_v58 = vpop.f32.mrb[36].mxu1  ;;  %v810_v60 = vmax.f32 %v686_v57, 0.0 }
 0x260   :  { %v1430_v61 = vpop.f32.mrb[37].mxu1 }
 0x261   :  { %v1431_v62 = vadd.f32 %v1430_v61, %v1429_v58  ;;  %v1432_v63 = vpop.f32.mrb[38].mxu1  ;;  %v841_v0 = vpack.c.bf16 %v810_v60, %v809_v59 }
 0x262   :  { %v1433_v1 = vpop.f32.mrb[39].mxu1 }
 0x263   :  { %v691_v2 = vadd.f32 %v1431_v62, %v2168_v51  ;;  %v1434_v3 = vadd.f32 %v1433_v1, %v1432_v63  ;;  %1719 = vmatprep.mubr.bf16.mxu0 %v841_v0 }
 0x265   :  { %v694_v4 = vadd.f32 %v1434_v3, %v2168_v51  ;;  %v811_v5 = vmax.f32 %v691_v2, 0.0 }
 0x267   :  { %v812_v6 = vmax.f32 %v694_v4, 0.0  ;;  %v1435_v7 = vpop.f32.mrb[40].mxu1 }
 0x268   :  { %v1436_v8 = vpop.f32.mrb[41].mxu1 }
 0x269   :  { %v1437_v9 = vadd.f32 %v1436_v8, %v1435_v7  ;;  %v842_v10 = vpack.c.bf16 %v812_v6, %v811_v5  ;;  %v1438_v12 = vpop.f32.mrb[42].mxu1 }
 0x26a   :  { %v1439_v14 = vpop.f32.mrb[43].mxu1 }
 0x26b   :  { %v699_v38 = vadd.f32 %v1437_v9, %v2168_v51  ;;  %1720 = vmatmul.mubr.bf16.vlgmr.msra.gmra.mrb[0].mxu0 %v842_v10  ;;  %v1440_v39 = vadd.f32 %v1439_v14, %v1438_v12 }
 0x26d   :  { %v702_v42 = vadd.f32 %v1440_v39, %v2168_v51  ;;  %v813_v43 = vmax.f32 %v699_v38, 0.0 }
 0x26f   :  { %v814_v49 = vmax.f32 %v702_v42, 0.0  ;;  %v1441_v50 = vpop.f32.mrb[44].mxu1 }
 0x270   :  { %v1442_v52 = vpop.f32.mrb[45].mxu1 }
 0x271   :  { %v1443_v53 = vadd.f32 %v1442_v52, %v1441_v50  ;;  %v1444_v54 = vpop.f32.mrb[46].mxu1  ;;  %v843_v55 = vpack.c.bf16 %v814_v49, %v813_v43 }
 0x272   :  { %v1445_v56 = vpop.f32.mrb[47].mxu1 }
 0x273   :  { %v707_v57 = vadd.f32 %v1443_v53, %v2168_v51  ;;  %v1446_v58 = vadd.f32 %v1445_v56, %v1444_v54  ;;  %1723 = vmatprep.mubr.bf16.mxu0 %v843_v55 }
 0x275   :  { %v710_v59 = vadd.f32 %v1446_v58, %v2168_v51  ;;  %v815_v60 = vmax.f32 %v707_v57, 0.0 }
 0x277   :  { %v816_v61 = vmax.f32 %v710_v59, 0.0  ;;  %v1447_v62 = vpop.f32.mrb[48].mxu1 }
 0x278   :  { %v1448_v63 = vpop.f32.mrb[49].mxu1 }
 0x279   :  { %v1449_v0 = vadd.f32 %v1448_v63, %v1447_v62  ;;  %v1450_v1 = vpop.f32.mrb[50].mxu1  ;;  %v844_v2 = vpack.c.bf16 %v816_v61, %v815_v60 }
 0x27a   :  { %v1451_v3 = vpop.f32.mrb[51].mxu1 }
 0x27b   :  { %v715_v4 = vadd.f32 %v1449_v0, %v2168_v51  ;;  %1724 = vmatmul.mubr.bf16.gmra.mrb[4].mxu0 %v844_v2  ;;  %v1452_v5 = vadd.f32 %v1451_v3, %v1450_v1 }
 0x27d   :  { %v718_v6 = vadd.f32 %v1452_v5, %v2168_v51  ;;  %v817_v7 = vmax.f32 %v715_v4, 0.0 }
 0x27f   :  { %v818_v8 = vmax.f32 %v718_v6, 0.0  ;;  %v1453_v9 = vpop.f32.mrb[52].mxu1 }
 0x280   :  { %v1454_v10 = vpop.f32.mrb[53].mxu1 }
 0x281   :  { %v1455_v12 = vadd.f32 %v1454_v10, %v1453_v9  ;;  %v1456_v14 = vpop.f32.mrb[54].mxu1  ;;  %v845_v38 = vpack.c.bf16 %v818_v8, %v817_v7 }
 0x282   :  { %v1457_v39 = vpop.f32.mrb[55].mxu1 }
 0x283   :  { %v723_v42 = vadd.f32 %v1455_v12, %v2168_v51  ;;  %v1458_v43 = vadd.f32 %v1457_v39, %v1456_v14  ;;  %1727 = vmatprep.mubr.bf16.mxu0 %v845_v38 }
 0x285   :  { %v726_v49 = vadd.f32 %v1458_v43, %v2168_v51  ;;  %v819_v50 = vmax.f32 %v723_v42, 0.0 }
 0x287   :  { %v820_v52 = vmax.f32 %v726_v49, 0.0  ;;  %v1459_v53 = vpop.f32.mrb[56].mxu1 }
 0x288   :  { %v1460_v54 = vpop.f32.mrb[57].mxu1 }
 0x289   :  { %v1461_v55 = vadd.f32 %v1460_v54, %v1459_v53  ;;  %v1462_v56 = vpop.f32.mrb[58].mxu1  ;;  %v846_v57 = vpack.c.bf16 %v820_v52, %v819_v50 }
 0x28a   :  { %v1463_v58 = vpop.f32.mrb[59].mxu1 }
 0x28b   :  { %v731_v59 = vadd.f32 %v1461_v55, %v2168_v51  ;;  %v1464_v60 = vadd.f32 %v1463_v58, %v1462_v56  ;;  %1728 = vmatmul.mubr.bf16.gmra.mrb[8].mxu0 %v846_v57 }
 0x28d   :  { %v734_v61 = vadd.f32 %v1464_v60, %v2168_v51  ;;  %v821_v62 = vmax.f32 %v731_v59, 0.0 }
 0x28f   :  { %v822_v63 = vmax.f32 %v734_v61, 0.0  ;;  %v1465_v0 = vpop.f32.mrb[60].mxu1 }
 0x290   :  { %v1466_v1 = vpop.f32.mrb[61].mxu1 }
 0x291   :  { %v1467_v2 = vadd.f32 %v1466_v1, %v1465_v0  ;;  %v1468_v3 = vpop.f32.mrb[62].mxu1  ;;  %v847_v4 = vpack.c.bf16 %v822_v63, %v821_v62 }
 0x292   :  { %v1469_v5 = vpop.f32.mrb[63].mxu1 }
 0x293   :  { %v739_v6 = vadd.f32 %v1467_v2, %v2168_v51  ;;  %v1470_v7 = vadd.f32 %v1469_v5, %v1468_v3  ;;  %1731 = vmatprep.mubr.bf16.mxu0 %v847_v4 }
 0x295   :  { %v742_v8 = vadd.f32 %v1470_v7, %v2168_v51  ;;  %v823_v9 = vmax.f32 %v739_v6, 0.0 }
 0x297   :  { %v824_v10 = vmax.f32 %v742_v8, 0.0  ;;  %v1471_v12 = vpop.f32.mrb[64].mxu1 }
 0x298   :  { %v1472_v14 = vpop.f32.mrb[65].mxu1 }
 0x299   :  { %v1473_v38 = vadd.f32 %v1472_v14, %v1471_v12  ;;  %v1474_v39 = vpop.f32.mrb[66].mxu1  ;;  %v848_v42 = vpack.c.bf16 %v824_v10, %v823_v9 }
 0x29a   :  { %v1475_v43 = vpop.f32.mrb[67].mxu1 }
 0x29b   :  { %v747_v49 = vadd.f32 %v1473_v38, %v2168_v51  ;;  %v1476_v50 = vadd.f32 %v1475_v43, %v1474_v39  ;;  %1732 = vmatmul.mubr.bf16.gmra.mrb[12].mxu0 %v848_v42 }
 0x29d   :  { %v750_v52 = vadd.f32 %v1476_v50, %v2168_v51  ;;  %v825_v53 = vmax.f32 %v747_v49, 0.0 }
 0x29f   :  { %v826_v54 = vmax.f32 %v750_v52, 0.0  ;;  %v1477_v55 = vpop.f32.mrb[68].mxu1 }
 0x2a0   :  { %v1478_v56 = vpop.f32.mrb[69].mxu1 }
 0x2a1   :  { %v1479_v57 = vadd.f32 %v1478_v56, %v1477_v55  ;;  %v1480_v58 = vpop.f32.mrb[70].mxu1  ;;  %v849_v59 = vpack.c.bf16 %v826_v54, %v825_v53 }
 0x2a2   :  { %v1481_v60 = vpop.f32.mrb[71].mxu1 }
 0x2a3   :  { %v755_v61 = vadd.f32 %v1479_v57, %v2168_v51  ;;  %v1482_v62 = vadd.f32 %v1481_v60, %v1480_v58  ;;  %1735 = vmatprep.mubr.bf16.mxu0 %v849_v59 }
 0x2a5   :  { %v758_v63 = vadd.f32 %v1482_v62, %v2168_v51  ;;  %v827_v0 = vmax.f32 %v755_v61, 0.0 }
 0x2a7   :  { %v828_v1 = vmax.f32 %v758_v63, 0.0  ;;  %v1483_v2 = vpop.f32.mrb[72].mxu1 }
 0x2a8   :  { %v1484_v3 = vpop.f32.mrb[73].mxu1 }
 0x2a9   :  { %v850_v4 = vpack.c.bf16 %v828_v1, %v827_v0  ;;  %v1485_v5 = vadd.f32 %v1484_v3, %v1483_v2  ;;  %v1486_v6 = vpop.f32.mrb[74].mxu1 }
 0x2aa   :  { %v1487_v7 = vpop.f32.mrb[75].mxu1 }
 0x2ab   :  { %1736 = vmatmul.mubr.bf16.gmra.mrb[16].mxu0 %v850_v4  ;;  %v763_v8 = vadd.f32 %v1485_v5, %v2168_v51  ;;  %v1488_v9 = vadd.f32 %v1487_v7, %v1486_v6 }
 0x2ad   :  { %v766_v10 = vadd.f32 %v1488_v9, %v2168_v51  ;;  %v829_v12 = vmax.f32 %v763_v8, 0.0 }
 0x2af   :  { %v830_v14 = vmax.f32 %v766_v10, 0.0  ;;  %v1489_v38 = vpop.f32.mrb[76].mxu1 }
 0x2b0   :  { %v1490_v39 = vpop.f32.mrb[77].mxu1 }
 0x2b1   :  { %v1491_v42 = vadd.f32 %v1490_v39, %v1489_v38  ;;  %v1492_v43 = vpop.f32.mrb[78].mxu1  ;;  %v851_v49 = vpack.c.bf16 %v830_v14, %v829_v12 }
 0x2b2   :  { %v1493_v50 = vpop.f32.mrb[79].mxu1 }
 0x2b3   :  { %v771_v52 = vadd.f32 %v1491_v42, %v2168_v51  ;;  %v1494_v53 = vadd.f32 %v1493_v50, %v1492_v43  ;;  %1739 = vmatprep.mubr.bf16.mxu0 %v851_v49 }
 0x2b5   :  { %v774_v54 = vadd.f32 %v1494_v53, %v2168_v51  ;;  %v831_v55 = vmax.f32 %v771_v52, 0.0 }
 0x2b7   :  { %v832_v56 = vmax.f32 %v774_v54, 0.0  ;;  %v1495_v57 = vpop.f32.mrb[80].mxu1 }
 0x2b8   :  { %v1496_v58 = vpop.f32.mrb[81].mxu1 }
 0x2b9   :  { %v852_v59 = vpack.c.bf16 %v832_v56, %v831_v55  ;;  %v1497_v60 = vadd.f32 %v1496_v58, %v1495_v57  ;;  %v1498_v61 = vpop.f32.mrb[82].mxu1 }
 0x2ba   :  { %v1499_v62 = vpop.f32.mrb[83].mxu1 }
 0x2bb   :  { %1740 = vmatmul.mubr.bf16.gmra.mrb[20].mxu0 %v852_v59  ;;  %v779_v63 = vadd.f32 %v1497_v60, %v2168_v51  ;;  %v1500_v0 = vadd.f32 %v1499_v62, %v1498_v61 }
 0x2bd   :  { %v782_v1 = vadd.f32 %v1500_v0, %v2168_v51  ;;  %v833_v2 = vmax.f32 %v779_v63, 0.0 }
 0x2bf   :  { %v834_v3 = vmax.f32 %v782_v1, 0.0  ;;  %v1501_v4 = vpop.f32.mrb[84].mxu1 }
 0x2c0   :  { %v1502_v5 = vpop.f32.mrb[85].mxu1 }
 0x2c1   :  { %v1503_v6 = vadd.f32 %v1502_v5, %v1501_v4  ;;  %v1504_v7 = vpop.f32.mrb[86].mxu1  ;;  %v853_v8 = vpack.c.bf16 %v834_v3, %v833_v2 }
 0x2c2   :  { %v1505_v9 = vpop.f32.mrb[87].mxu1 }
 0x2c3   :  { %v787_v10 = vadd.f32 %v1503_v6, %v2168_v51  ;;  %v1506_v12 = vadd.f32 %v1505_v9, %v1504_v7  ;;  %1743 = vmatprep.mubr.bf16.mxu0 %v853_v8 }
 0x2c5   :  { %v790_v14 = vadd.f32 %v1506_v12, %v2168_v51  ;;  %v835_v38 = vmax.f32 %v787_v10, 0.0 }
 0x2c7   :  { %v836_v39 = vmax.f32 %v790_v14, 0.0  ;;  %v1507_v42 = vpop.f32.mrb[88].mxu1 }
 0x2c8   :  { %v1508_v43 = vpop.f32.mrb[89].mxu1 }
 0x2c9   :  { %v854_v49 = vpack.c.bf16 %v836_v39, %v835_v38  ;;  %v1509_v50 = vadd.f32 %v1508_v43, %v1507_v42  ;;  %v1510_v52 = vpop.f32.mrb[90].mxu1 }
 0x2ca   :  { %v1511_v53 = vpop.f32.mrb[91].mxu1 }
 0x2cb   :  { %1744 = vmatmul.mubr.bf16.gmra.mrb[24].mxu0 %v854_v49  ;;  %v795_v54 = vadd.f32 %v1509_v50, %v2168_v51  ;;  %v1512_v55 = vadd.f32 %v1511_v53, %v1510_v52 }
 0x2cd   :  { %v798_v56 = vadd.f32 %v1512_v55, %v2168_v51  ;;  %v837_v57 = vmax.f32 %v795_v54, 0.0 }
 0x2cf   :  { %v838_v58 = vmax.f32 %v798_v56, 0.0  ;;  %v1513_v59 = vpop.f32.mrb[92].mxu1 }
 0x2d0   :  { %v1514_v60 = vpop.f32.mrb[93].mxu1 }
 0x2d1   :  { %v1515_v61 = vadd.f32 %v1514_v60, %v1513_v59  ;;  %v1516_v62 = vpop.f32.mrb[94].mxu1  ;;  %v855_v63 = vpack.c.bf16 %v838_v58, %v837_v57 }
 0x2d2   :  { %v1517_v0 = vpop.f32.mrb[95].mxu1 }
 0x2d3   :  { %v803_v1 = vadd.f32 %v1515_v61, %v2168_v51  ;;  %v1518_v2 = vadd.f32 %v1517_v0, %v1516_v62  ;;  %1747 = vmatprep.mubr.bf16.mxu0 %v855_v63 }
 0x2d5   :  { %v806_v3 = vadd.f32 %v1518_v2, %v2168_v51  ;;  %v839_v4 = vmax.f32 %v803_v1, 0.0 }
 0x2d7   :  { %v840_v5 = vmax.f32 %v806_v3, 0.0 }
 0x2d9   :  { %v856_v6 = vpack.c.bf16 %v840_v5, %v839_v4 }
 0x2db   :  { %1748 = vmatmul.mubr.bf16.gmra.mrb[28].mxu0 %v856_v6 }
 0x2dc   :  { %1137 = vmatprep.mubr.bf16.mxu0 %v2069_v24 }
 0x33e   :  { %v1721_v7 = vpop.f32.mrb[0].mxu0 }
 0x33f   :  { %v955_v8 = vpop.f32.mrb[1].mxu0 }
 0x340   :  { %v1722_v9 = vpop.f32.mrb[2].mxu0 }
 0x341   :  { %v1083_v10 = vpack.c.bf16 %v1722_v9, %v1721_v7  ;;  %v958_v12 = vpop.f32.mrb[3].mxu0 }
 0x342   :  { %v1082_v14 = vpack.c.bf16 %v958_v12, %v955_v8 }
 0x34e   :  { %v1725_v38 = vpop.f32.mrb[4].mxu0 }
 0x34f   :  { %v971_v39 = vpop.f32.mrb[5].mxu0 }
 0x350   :  { %v1726_v42 = vpop.f32.mrb[6].mxu0 }
 0x351   :  { %v1085_v43 = vpack.c.bf16 %v1726_v42, %v1725_v38  ;;  %v974_v49 = vpop.f32.mrb[7].mxu0 }
 0x352   :  { %v1084_v50 = vpack.c.bf16 %v974_v49, %v971_v39 }
 0x35e   :  { %v1729_v52 = vpop.f32.mrb[8].mxu0 }
 0x35f   :  { %v987_v51 = vpop.f32.mrb[9].mxu0 }
 0x360   :  { %v1730_v53 = vpop.f32.mrb[10].mxu0 }
 0x361   :  { %v1087_v54 = vpack.c.bf16 %v1730_v53, %v1729_v52  ;;  %v990_v55 = vpop.f32.mrb[11].mxu0 }
 0x362   :  { %v1086_v56 = vpack.c.bf16 %v990_v55, %v987_v51 }
 0x36e   :  { %v1733_v57 = vpop.f32.mrb[12].mxu0 }
 0x36f   :  { %v1003_v24 = vpop.f32.mrb[13].mxu0 }
 0x370   :  { %v1734_v58 = vpop.f32.mrb[14].mxu0 }
 0x371   :  { %v1089_v59 = vpack.c.bf16 %v1734_v58, %v1733_v57  ;;  %v1006_v60 = vpop.f32.mrb[15].mxu0 }
 0x372   :  { %v1088_v61 = vpack.c.bf16 %v1006_v60, %v1003_v24 }
 0x37e   :  { %v1737_v62 = vpop.f32.mrb[16].mxu0 }
 0x37f   :  { %v1019_v63 = vpop.f32.mrb[17].mxu0 }
 0x380   :  { %v1738_v0 = vpop.f32.mrb[18].mxu0 }
 0x381   :  { %v1091_v1 = vpack.c.bf16 %v1738_v0, %v1737_v62  ;;  %v1022_v2 = vpop.f32.mrb[19].mxu0 }
 0x382   :  { %v1090_v3 = vpack.c.bf16 %v1022_v2, %v1019_v63 }
 0x384   :  { %1543 = vmatprep.subr.bf16.mxu0 %v1090_v3 }
 0x385   :  { %1544 = vmatpush3.bf16.msra.mxu0 %v1082_v14 }
 0x386   :  { %1545 = vmatprep.subr.bf16.mxu0 %v1091_v1 }
 0x389   :  { %1546 = vmatpush3.bf16.msra.mxu0 %v1083_v10 }
 0x38e   :  { %v1741_v4 = vpop.f32.mrb[20].mxu0 }
 0x38f   :  { %v1035_v5 = vpop.f32.mrb[21].mxu0 }
 0x390   :  { %v1742_v6 = vpop.f32.mrb[22].mxu0 }
 0x391   :  { %v1093_v7 = vpack.c.bf16 %v1742_v6, %v1741_v4  ;;  %v1038_v8 = vpop.f32.mrb[23].mxu0 }
 0x392   :  { %v1092_v9 = vpack.c.bf16 %v1038_v8, %v1035_v5 }
 0x394   :  { %1547 = vmatprep.subr.bf16.mxu0 %v1092_v9 }
 0x395   :  { %1548 = vmatpush3.bf16.msra.mxu0 %v1084_v50 }
 0x396   :  { %1549 = vmatprep.subr.bf16.mxu0 %v1093_v7 }
 0x399   :  { %1550 = vmatpush3.bf16.msra.mxu0 %v1085_v43 }
 0x39e   :  { %v1745_v12 = vpop.f32.mrb[24].mxu0 }
 0x39f   :  { %v1051_v38 = vpop.f32.mrb[25].mxu0 }
 0x3a0   :  { %v1746_v39 = vpop.f32.mrb[26].mxu0 }
 0x3a1   :  { %v1095_v42 = vpack.c.bf16 %v1746_v39, %v1745_v12  ;;  %v1054_v49 = vpop.f32.mrb[27].mxu0 }
 0x3a2   :  { %v1094_v52 = vpack.c.bf16 %v1054_v49, %v1051_v38 }
 0x3a4   :  { %1551 = vmatprep.subr.bf16.mxu0 %v1094_v52 }
 0x3a5   :  { %1552 = vmatpush3.bf16.msra.mxu0 %v1086_v56 }
 0x3a6   :  { %1553 = vmatprep.subr.bf16.mxu0 %v1095_v42 }
 0x3a9   :  { %1554 = vmatpush3.bf16.msra.mxu0 %v1087_v54 }
 0x3ae   :  { %v1749_v10 = vpop.f32.mrb[28].mxu0 }
 0x3af   :  { %v1067_v14 = vpop.f32.mrb[29].mxu0 }
 0x3b0   :  { %v1750_v51 = vpop.f32.mrb[30].mxu0 }
 0x3b1   :  { %v1097_v53 = vpack.c.bf16 %v1750_v51, %v1749_v10  ;;  %v1070_v55 = vpop.f32.mrb[31].mxu0 }
 0x3b2   :  { %v1096_v57 = vpack.c.bf16 %v1070_v55, %v1067_v14 }
 0x3b4   :  { %1555 = vmatprep.subr.bf16.mxu0 %v1096_v57 }
 0x3b5   :  { %1556 = vmatpush3.bf16.msra.mxu0 %v1088_v61 }
 0x3b6   :  { %1557 = vmatprep.subr.bf16.mxu0 %v1097_v53 }
 0x3b9   :  { %1558 = vmatpush3.bf16.msra.mxu0 %v1089_v59 }
 0x3bc   :  { %1138 = vmatmul.mubr.bf16.vlgmr.msra.gmra.mrb[32].mxu0 %v2072_v11 }
 0x3bd   :  { %1145 = vmatprep.mubr.bf16.mxu0 %v2074_v13  ;;  %v2237_v13 = vld [vmem:[%s2291_s5] ss:$0 sm:$0xff]  ;;  %s1966_s5 = smov [#allocation10]  }
 0x3be   :  { %s1303_s25 = sshll.u32 %s1966_s5, 4  ;;  %s1304_s25 = int_to_ptr.vmem [resolvable:$true] %s1303_s25 }
 0x3bf   :  { %s1928_s26 = scalar_lea.vmem %s1304_s25, 4096  ;;  %p1933_p5 = scmp.lt.s32.totalorder %s1304_s25, %s1304_s25 }
 0x3c0   :  { %p1929_p4 = scmp.ne.s32.totalorder %s1304_s25, %s1928_s26  ;;  %p1934_p6 = scmp.lt.s32.totalorder %s1928_s26, %s1928_s26 }
 0x3c2   :  { %p1935_p7 = por %p1934_p6, %p1933_p5 }
 0x3c4   :  { %1146 = vmatmul.mubr.bf16.gmra.mrb[36].mxu0 %v2078_v15  ;;  %p1936_p8 = pnand %p1935_p7, %p1929_p4 }
 0x3c5   :  { %1153 = vmatprep.mubr.bf16.mxu0 %v2080_v16 }
 0x3cc   :  { %1154 = vmatmul.mubr.bf16.gmra.mrb[40].mxu0 %v2084_v17 }
 0x3cd   :  { %1161 = vmatprep.mubr.bf16.mxu0 %v2086_v18 }
 0x3d4   :  { %1162 = vmatmul.mubr.bf16.gmra.mrb[44].mxu0 %v2090_v19 }
 0x3d5   :  { %1169 = vmatprep.mubr.bf16.mxu0 %v2092_v20 }
 0x3dc   :  { %1170 = vmatmul.mubr.bf16.gmra.mrb[48].mxu0 %v2096_v21 }
 0x3dd   :  { %1177 = vmatprep.mubr.bf16.mxu0 %v2098_v22 }
 0x3e4   :  { %1178 = vmatmul.mubr.bf16.gmra.mrb[52].mxu0 %v2102_v23 }
 0x3e5   :  { %1185 = vmatprep.mubr.bf16.mxu0 %v2104_v25 }
 0x3ec   :  { %1186 = vmatmul.mubr.bf16.gmra.mrb[56].mxu0 %v2108_v26 }
 0x3ed   :  { %1193 = vmatprep.mubr.bf16.mxu0 %v2110_v27 }
 0x3f4   :  { %1194 = vmatmul.mubr.bf16.gmra.mrb[60].mxu0 %v2114_v28 }
 0x3f5   :  { %1201 = vmatprep.mubr.bf16.mxu0 %v2116_v29 }
 0x3fc   :  { %1202 = vmatmul.mubr.bf16.gmra.mrb[64].mxu0 %v2120_v30 }
 0x3fd   :  { %1209 = vmatprep.mubr.bf16.mxu0 %v2122_v31 }
 0x404   :  { %1210 = vmatmul.mubr.bf16.gmra.mrb[68].mxu0 %v2126_v32 }
 0x405   :  { %1217 = vmatprep.mubr.bf16.mxu0 %v2128_v33 }
 0x40c   :  { %1218 = vmatmul.mubr.bf16.gmra.mrb[72].mxu0 %v2132_v34 }
 0x40d   :  { %1225 = vmatprep.mubr.bf16.mxu0 %v2134_v35 }
 0x414   :  { %1226 = vmatmul.mubr.bf16.gmra.mrb[76].mxu0 %v2138_v36 }
 0x415   :  { %1233 = vmatprep.mubr.bf16.mxu0 %v2140_v37 }
 0x41c   :  { %1234 = vmatmul.mubr.bf16.gmra.mrb[80].mxu0 %v2144_v40 }
 0x41d   :  { %1241 = vmatprep.mubr.bf16.mxu0 %v2146_v41 }
 0x424   :  { %1242 = vmatmul.mubr.bf16.gmra.mrb[84].mxu0 %v2150_v44 }
 0x425   :  { %1249 = vmatprep.mubr.bf16.mxu0 %v2152_v45 }
 0x42c   :  { %1250 = vmatmul.mubr.bf16.gmra.mrb[88].mxu0 %v2156_v46 }
 0x42d   :  { %1257 = vmatprep.mubr.bf16.mxu0 %v2158_v47 }
 0x434   :  { %1258 = vmatmul.mubr.bf16.gmra.mrb[92].mxu0 %v2162_v48 }
 0x48f   :  { %v1559_v11 = vpop.f32.mrb[32].mxu0 }
 0x490   :  { %v1560_v15 = vpop.f32.mrb[33].mxu0 }
 0x491   :  { %v1561_v16 = vadd.f32 %v1560_v15, %v1559_v11  ;;  %v1562_v17 = vpop.f32.mrb[34].mxu0 }
 0x492   :  { %v1563_v18 = vpop.f32.mrb[35].mxu0 }
 0x493   :  { %v1140_v19 = vadd.f32 %v1561_v16, %v2237_v13  ;;  %v1564_v20 = vadd.f32 %v1563_v18, %v1562_v17 }
 0x495   :  { %1266 = vst [vmem:[#allocation10] sm:$0xff] %v1140_v19  ;;  %v1143_v21 = vadd.f32 %v1564_v20, %v2237_v13 }
 0x497   :  { %1267 = vst [vmem:[#allocation10 + $0x8] sm:$0xff] %v1143_v21  ;;  %v1565_v22 = vpop.f32.mrb[36].mxu0 }
 0x498   :  { %v1566_v23 = vpop.f32.mrb[37].mxu0 }
 0x499   :  { %v1567_v25 = vadd.f32 %v1566_v23, %v1565_v22  ;;  %v1568_v26 = vpop.f32.mrb[38].mxu0 }
 0x49a   :  { %v1569_v27 = vpop.f32.mrb[39].mxu0 }
 0x49b   :  { %v1148_v28 = vadd.f32 %v1567_v25, %v2237_v13  ;;  %v1570_v29 = vadd.f32 %v1569_v27, %v1568_v26 }
 0x49d   :  { %1268 = vst [vmem:[#allocation10 + $0x10] sm:$0xff] %v1148_v28  ;;  %v1151_v30 = vadd.f32 %v1570_v29, %v2237_v13 }
 0x49f   :  { %1269 = vst [vmem:[#allocation10 + $0x18] sm:$0xff] %v1151_v30  ;;  %v1571_v31 = vpop.f32.mrb[40].mxu0 }
 0x4a0   :  { %v1572_v32 = vpop.f32.mrb[41].mxu0 }
 0x4a1   :  { %v1573_v33 = vadd.f32 %v1572_v32, %v1571_v31  ;;  %v1574_v34 = vpop.f32.mrb[42].mxu0 }
 0x4a2   :  { %v1575_v35 = vpop.f32.mrb[43].mxu0 }
 0x4a3   :  { %v1156_v36 = vadd.f32 %v1573_v33, %v2237_v13  ;;  %v1576_v37 = vadd.f32 %v1575_v35, %v1574_v34 }
 0x4a5   :  { %1270 = vst [vmem:[#allocation10 + $0x20] sm:$0xff] %v1156_v36  ;;  %v1159_v40 = vadd.f32 %v1576_v37, %v2237_v13 }
 0x4a7   :  { %1271 = vst [vmem:[#allocation10 + $0x28] sm:$0xff] %v1159_v40  ;;  %v1577_v41 = vpop.f32.mrb[44].mxu0 }
 0x4a8   :  { %v1578_v44 = vpop.f32.mrb[45].mxu0 }
 0x4a9   :  { %v1579_v45 = vadd.f32 %v1578_v44, %v1577_v41  ;;  %v1580_v46 = vpop.f32.mrb[46].mxu0 }
 0x4aa   :  { %v1581_v47 = vpop.f32.mrb[47].mxu0 }
 0x4ab   :  { %v1164_v48 = vadd.f32 %v1579_v45, %v2237_v13  ;;  %v1582_v43 = vadd.f32 %v1581_v47, %v1580_v46 }
 0x4ad   :  { %1272 = vst [vmem:[#allocation10 + $0x30] sm:$0xff] %v1164_v48  ;;  %v1167_v50 = vadd.f32 %v1582_v43, %v2237_v13 }
 0x4af   :  { %1273 = vst [vmem:[#allocation10 + $0x38] sm:$0xff] %v1167_v50  ;;  %v1583_v54 = vpop.f32.mrb[48].mxu0 }
 0x4b0   :  { %v1584_v56 = vpop.f32.mrb[49].mxu0 }
 0x4b1   :  { %v1585_v24 = vadd.f32 %v1584_v56, %v1583_v54  ;;  %v1586_v58 = vpop.f32.mrb[50].mxu0 }
 0x4b2   :  { %v1587_v59 = vpop.f32.mrb[51].mxu0 }
 0x4b3   :  { %v1172_v60 = vadd.f32 %v1585_v24, %v2237_v13  ;;  %v1588_v61 = vadd.f32 %v1587_v59, %v1586_v58 }
 0x4b5   :  { %1274 = vst [vmem:[#allocation10 + $0x40] sm:$0xff] %v1172_v60  ;;  %v1175_v62 = vadd.f32 %v1588_v61, %v2237_v13 }
 0x4b7   :  { %1275 = vst [vmem:[#allocation10 + $0x48] sm:$0xff] %v1175_v62  ;;  %v1589_v63 = vpop.f32.mrb[52].mxu0 }
 0x4b8   :  { %v1590_v0 = vpop.f32.mrb[53].mxu0 }
 0x4b9   :  { %v1591_v1 = vadd.f32 %v1590_v0, %v1589_v63  ;;  %v1592_v2 = vpop.f32.mrb[54].mxu0 }
 0x4ba   :  { %v1593_v3 = vpop.f32.mrb[55].mxu0 }
 0x4bb   :  { %v1180_v4 = vadd.f32 %v1591_v1, %v2237_v13  ;;  %v1594_v5 = vadd.f32 %v1593_v3, %v1592_v2 }
 0x4bd   :  { %1276 = vst [vmem:[#allocation10 + $0x50] sm:$0xff] %v1180_v4  ;;  %v1183_v6 = vadd.f32 %v1594_v5, %v2237_v13 }
 0x4bf   :  { %1277 = vst [vmem:[#allocation10 + $0x58] sm:$0xff] %v1183_v6  ;;  %v1595_v7 = vpop.f32.mrb[56].mxu0 }
 0x4c0   :  { %v1596_v8 = vpop.f32.mrb[57].mxu0 }
 0x4c1   :  { %v1597_v9 = vadd.f32 %v1596_v8, %v1595_v7  ;;  %v1598_v12 = vpop.f32.mrb[58].mxu0 }
 0x4c2   :  { %v1599_v38 = vpop.f32.mrb[59].mxu0 }
 0x4c3   :  { %v1188_v39 = vadd.f32 %v1597_v9, %v2237_v13  ;;  %v1600_v42 = vadd.f32 %v1599_v38, %v1598_v12 }
 0x4c5   :  { %1278 = vst [vmem:[#allocation10 + $0x60] sm:$0xff] %v1188_v39  ;;  %v1191_v49 = vadd.f32 %v1600_v42, %v2237_v13 }
 0x4c7   :  { %1279 = vst [vmem:[#allocation10 + $0x68] sm:$0xff] %v1191_v49  ;;  %v1601_v52 = vpop.f32.mrb[60].mxu0 }
 0x4c8   :  { %v1602_v10 = vpop.f32.mrb[61].mxu0 }
 0x4c9   :  { %v1603_v14 = vadd.f32 %v1602_v10, %v1601_v52  ;;  %v1604_v51 = vpop.f32.mrb[62].mxu0 }
 0x4ca   :  { %v1605_v53 = vpop.f32.mrb[63].mxu0 }
 0x4cb   :  { %v1196_v55 = vadd.f32 %v1603_v14, %v2237_v13  ;;  %v1606_v57 = vadd.f32 %v1605_v53, %v1604_v51 }
 0x4cd   :  { %1280 = vst [vmem:[#allocation10 + $0x70] sm:$0xff] %v1196_v55  ;;  %v1199_v11 = vadd.f32 %v1606_v57, %v2237_v13 }
 0x4cf   :  { %1281 = vst [vmem:[#allocation10 + $0x78] sm:$0xff] %v1199_v11  ;;  %v1607_v15 = vpop.f32.mrb[64].mxu0 }
 0x4d0   :  { %v1608_v16 = vpop.f32.mrb[65].mxu0 }
 0x4d1   :  { %v1609_v17 = vadd.f32 %v1608_v16, %v1607_v15  ;;  %v1610_v18 = vpop.f32.mrb[66].mxu0 }
 0x4d2   :  { %v1611_v19 = vpop.f32.mrb[67].mxu0 }
 0x4d3   :  { %v1204_v20 = vadd.f32 %v1609_v17, %v2237_v13  ;;  %v1612_v21 = vadd.f32 %v1611_v19, %v1610_v18 }
 0x4d5   :  { %1282 = vst [vmem:[#allocation10 + $0x80] sm:$0xff] %v1204_v20  ;;  %v1207_v22 = vadd.f32 %v1612_v21, %v2237_v13 }
 0x4d7   :  { %1283 = vst [vmem:[#allocation10 + $0x88] sm:$0xff] %v1207_v22  ;;  %v1613_v23 = vpop.f32.mrb[68].mxu0 }
 0x4d8   :  { %v1614_v25 = vpop.f32.mrb[69].mxu0 }
 0x4d9   :  { %v1615_v26 = vadd.f32 %v1614_v25, %v1613_v23  ;;  %v1616_v27 = vpop.f32.mrb[70].mxu0 }
 0x4da   :  { %v1617_v28 = vpop.f32.mrb[71].mxu0 }
 0x4db   :  { %v1212_v29 = vadd.f32 %v1615_v26, %v2237_v13  ;;  %v1618_v30 = vadd.f32 %v1617_v28, %v1616_v27 }
 0x4dd   :  { %1284 = vst [vmem:[#allocation10 + $0x90] sm:$0xff] %v1212_v29  ;;  %v1215_v31 = vadd.f32 %v1618_v30, %v2237_v13 }
 0x4df   :  { %1285 = vst [vmem:[#allocation10 + $0x98] sm:$0xff] %v1215_v31  ;;  %v1619_v32 = vpop.f32.mrb[72].mxu0 }
 0x4e0   :  { %v1620_v33 = vpop.f32.mrb[73].mxu0 }
 0x4e1   :  { %v1621_v34 = vadd.f32 %v1620_v33, %v1619_v32  ;;  %v1622_v35 = vpop.f32.mrb[74].mxu0 }
 0x4e2   :  { %v1623_v36 = vpop.f32.mrb[75].mxu0 }
 0x4e3   :  { %v1220_v37 = vadd.f32 %v1621_v34, %v2237_v13  ;;  %v1624_v40 = vadd.f32 %v1623_v36, %v1622_v35 }
 0x4e5   :  { %1286 = vst [vmem:[#allocation10 + $0xa0] sm:$0xff] %v1220_v37  ;;  %v1223_v41 = vadd.f32 %v1624_v40, %v2237_v13 }
 0x4e7   :  { %1287 = vst [vmem:[#allocation10 + $0xa8] sm:$0xff] %v1223_v41  ;;  %v1625_v44 = vpop.f32.mrb[76].mxu0 }
 0x4e8   :  { %v1626_v45 = vpop.f32.mrb[77].mxu0 }
 0x4e9   :  { %v1627_v46 = vadd.f32 %v1626_v45, %v1625_v44  ;;  %v1628_v47 = vpop.f32.mrb[78].mxu0 }
 0x4ea   :  { %v1629_v48 = vpop.f32.mrb[79].mxu0 }
 0x4eb   :  { %v1228_v43 = vadd.f32 %v1627_v46, %v2237_v13  ;;  %v1630_v50 = vadd.f32 %v1629_v48, %v1628_v47 }
 0x4ed   :  { %1288 = vst [vmem:[#allocation10 + $0xb0] sm:$0xff] %v1228_v43  ;;  %v1231_v54 = vadd.f32 %v1630_v50, %v2237_v13 }
 0x4ef   :  { %1289 = vst [vmem:[#allocation10 + $0xb8] sm:$0xff] %v1231_v54  ;;  %v1631_v56 = vpop.f32.mrb[80].mxu0 }
 0x4f0   :  { %v1632_v24 = vpop.f32.mrb[81].mxu0 }
 0x4f1   :  { %v1633_v58 = vadd.f32 %v1632_v24, %v1631_v56  ;;  %v1634_v59 = vpop.f32.mrb[82].mxu0 }
 0x4f2   :  { %v1635_v60 = vpop.f32.mrb[83].mxu0 }
 0x4f3   :  { %v1236_v61 = vadd.f32 %v1633_v58, %v2237_v13  ;;  %v1636_v62 = vadd.f32 %v1635_v60, %v1634_v59 }
 0x4f5   :  { %1290 = vst [vmem:[#allocation10 + $0xc0] sm:$0xff] %v1236_v61  ;;  %v1239_v63 = vadd.f32 %v1636_v62, %v2237_v13 }
 0x4f7   :  { %1291 = vst [vmem:[#allocation10 + $0xc8] sm:$0xff] %v1239_v63  ;;  %v1637_v0 = vpop.f32.mrb[84].mxu0 }
 0x4f8   :  { %v1638_v1 = vpop.f32.mrb[85].mxu0 }
 0x4f9   :  { %v1639_v2 = vadd.f32 %v1638_v1, %v1637_v0  ;;  %v1640_v3 = vpop.f32.mrb[86].mxu0 }
 0x4fa   :  { %v1641_v4 = vpop.f32.mrb[87].mxu0 }
 0x4fb   :  { %v1244_v5 = vadd.f32 %v1639_v2, %v2237_v13  ;;  %v1642_v6 = vadd.f32 %v1641_v4, %v1640_v3 }
 0x4fd   :  { %1292 = vst [vmem:[#allocation10 + $0xd0] sm:$0xff] %v1244_v5  ;;  %v1247_v7 = vadd.f32 %v1642_v6, %v2237_v13 }
 0x4ff   :  { %1293 = vst [vmem:[#allocation10 + $0xd8] sm:$0xff] %v1247_v7  ;;  %v1643_v8 = vpop.f32.mrb[88].mxu0 }
 0x500   :  { %v1644_v9 = vpop.f32.mrb[89].mxu0 }
 0x501   :  { %v1645_v12 = vadd.f32 %v1644_v9, %v1643_v8  ;;  %v1646_v38 = vpop.f32.mrb[90].mxu0 }
 0x502   :  { %v1647_v39 = vpop.f32.mrb[91].mxu0 }
 0x503   :  { %v1252_v42 = vadd.f32 %v1645_v12, %v2237_v13  ;;  %v1648_v49 = vadd.f32 %v1647_v39, %v1646_v38 }
 0x505   :  { %1294 = vst [vmem:[#allocation10 + $0xe0] sm:$0xff] %v1252_v42  ;;  %v1255_v52 = vadd.f32 %v1648_v49, %v2237_v13 }
 0x507   :  { %1295 = vst [vmem:[#allocation10 + $0xe8] sm:$0xff] %v1255_v52  ;;  %v1649_v10 = vpop.f32.mrb[92].mxu0 }
 0x508   :  { %v1650_v14 = vpop.f32.mrb[93].mxu0 }
 0x509   :  { %v1651_v51 = vadd.f32 %v1650_v14, %v1649_v10  ;;  %v1652_v53 = vpop.f32.mrb[94].mxu0 }
 0x50a   :  { %v1653_v55 = vpop.f32.mrb[95].mxu0 }
 0x50b   :  { %v1260_v57 = vadd.f32 %v1651_v51, %v2237_v13  ;;  %v1654_v11 = vadd.f32 %v1653_v55, %v1652_v53 }
 0x50d   :  { %1296 = vst [vmem:[#allocation10 + $0xf0] sm:$0xff] %v1260_v57  ;;  %v1263_v15 = vadd.f32 %v1654_v11, %v2237_v13 }
 0x50f   :  { %1297 = vst [vmem:[#allocation10 + $0xf8] sm:$0xff] %v1263_v15 }
 0x510   :  { %1939 = shalt.err (!%p1936_p8)
}
 0x511   :  { %s1940_s29 = scalar_lea.hbm %s2292_s6, 4096 }
 0x512   :  { %p1941_p9 = scmp.ne.s32.totalorder %s2292_s6, %s1940_s29  ;;  %p1944_p10 = scmp.lt.u32.totalorder %s1940_s29, %s2292_s6 }
 0x514   :  { %p1946_p11 = pnand %p1944_p10, %p1941_p9 }
 0x516   :  { %1949 = shalt.err (!%p1946_p11)
}
 0x517   :  { %1309 = dma.vmem_to_hbm [thread:$0]  %s1304_s25, 4096, %s2292_s6, [#allocation4], %s1962_s1, %s1962_s1, %s1963_s21  }
 0x518   :  { %1956 = dma.done.wait [#allocation4], 4096  }
 0x519   :  { %1957 = vsyncadd [#allocation4], 4294963200 }
 0x51a   :  { %1313 = vsyncpa [#allocation3], 1 }
 0x51b   :  { %1314 = vsyncpa [#allocation6], 1 }
 0x51c   :  { %1315 = vsyncpa [#allocation9], 1 }
 0x51d   :  { %1316 = vsyncpa [#allocation4], 1 }

</bundles_post_ra>
